<compile_context>
chip_gen: v7x
topology: tpu7x:2x2x1
jax: 0.10.0
libtpu: 0.0.40
codegen_flags: <defaults>
</compile_context>

<pallas_src>
import functools

import jax
import jax.numpy as jnp
from jax import lax
from jax.experimental import pallas as pl
from jax.experimental.pallas import tpu as pltpu


def _ffm_kernel(x1_ref, x2_ref, w1a_ref, w1b_ref, bn_shift_ref, wse1_ref, wse2_ref,
                out_ref, pool_acc, se_scale, *cache_refs,
                inv_hw, hw_true, hw_tile, use_mxu, use_cache, mask_pool):
    # grid = (batch, phase, hw_tile); phase 0 = pooling pass, phase 1 = apply pass.
    # x1_ref: (1, C1a, T)   x2_ref: (1, C1b, T)   (input dtype, cast in-kernel)
    # w1a/w1b: (C2, C1a)/(C2, C1b) split 1x1-conv weight with BN scale folded in
    # bn_shift: (C2, 1) f32   wse1: (Cr, C2)   wse2: (C2, Cr) f32 SE weights
    # out_ref: (1, C2, T)     pool_acc/se_scale: (C2, 1) f32 scratch
    # cache_refs[0] (optional): (C2, HW_pad) fm cache scratch
    p = pl.program_id(1)
    k = pl.program_id(2)
    last_k = pl.num_programs(2) - 1

    def compute_fm():
        c2 = w1a_ref.shape[0]
        t = x1_ref.shape[-1]
        if use_mxu:
            # Fused concat + 1x1 conv on the MXU; bf16 inputs, f32 accumulation.
            x1 = x1_ref[0].astype(jnp.bfloat16)
            x2 = x2_ref[0].astype(jnp.bfloat16)
            y = (jnp.dot(w1a_ref[...], x1, preferred_element_type=jnp.float32)
                 + jnp.dot(w1b_ref[...], x2, preferred_element_type=jnp.float32))
        else:
            # Tiny channel count: f32 VPU broadcast multiply-accumulate (skip the MXU).
            x1 = x1_ref[0]
            x2 = x2_ref[0]
            wa = w1a_ref[...]
            wb = w1b_ref[...]
            y = jnp.zeros((c2, t), jnp.float32)
            for c in range(x1.shape[0]):
                y = y + wa[:, c:c + 1] * x1[c:c + 1, :]
            for c in range(x2.shape[0]):
                y = y + wb[:, c:c + 1] * x2[c:c + 1, :]
        # BN scale already folded into the weights; only the shift remains.  ReLU.
        return jnp.maximum(y + bn_shift_ref[...], 0.0)            # (C2, T) f32

    @pl.when((p == 0) & (k == 0))
    def _init():
        pool_acc[...] = jnp.zeros_like(pool_acc)
        # Defensive: the output block is resident (pinned) through phase 0; never let
        # it hold uninitialized VMEM even if a writeback were inserted at a boundary.
        out_ref[...] = jnp.zeros_like(out_ref)

    @pl.when(p == 0)
    def _pool_pass():
        fm = compute_fm()
        if mask_pool:
            col = k * hw_tile + lax.broadcasted_iota(jnp.int32, fm.shape, 1)
            fm_pool = jnp.where(col < hw_true, fm, 0.0)
        else:
            fm_pool = fm
        pool_acc[...] += jnp.sum(fm_pool, axis=1, keepdims=True)
        if use_cache:
            start = pl.multiple_of(k * hw_tile, hw_tile)
            cache_refs[0][:, pl.ds(start, hw_tile)] = fm.astype(cache_refs[0].dtype)

    @pl.when((p == 0) & (k == last_k))
    def _se():
        # AdaptiveAvgPool2d(1): divide the accumulated sum by the true HW.
        pooled = pool_acc[...] * inv_hw                                       # (C2, 1)
        h = jnp.maximum(
            jnp.dot(wse1_ref[...], pooled, preferred_element_type=jnp.float32), 0.0)
        se = jax.nn.sigmoid(
            jnp.dot(wse2_ref[...], h, preferred_element_type=jnp.float32))    # (C2, 1)
        se_scale[...] = 1.0 + se        # fm + fm*se == fm*(1+se)

    @pl.when(p == 1)
    def _apply():
        if use_cache:
            start = pl.multiple_of(k * hw_tile, hw_tile)
            fm = cache_refs[0][:, pl.ds(start, hw_tile)].astype(jnp.float32)
        else:
            fm = compute_fm()
        out_ref[0] = (fm * se_scale[...]).astype(out_ref.dtype)


def _use_mxu(c1a, c1b):
    return c1a >= 16 and c1b >= 16


def feature_fusion_module(x1, x2, params, hw_tile=None, out_dtype=None,
                          vmem_budget_bytes=40 << 20):
    """x1, x2: NCHW arrays sharing N, H, W.  Returns NCHW output of dtype out_dtype."""
    w1 = params["w1"]              # (C2, C1)   1x1 conv weight (bias-free)
    bn_scale = params["bn_scale"]  # (C2, 1)    folded BatchNorm scale
    bn_shift = params["bn_shift"]  # (C2, 1)    folded BatchNorm shift
    wse1 = params["wse1"]          # (Cr, C2)   SE squeeze conv weight
    wse2 = params["wse2"]          # (C2, Cr)   SE excite conv weight

    N, C1a, H, W = x1.shape
    C1b = x2.shape[1]
    C2 = w1.shape[0]
    Cr = wse1.shape[0]
    HW = H * W
    out_dtype = jnp.dtype(out_dtype) if out_dtype is not None else jnp.dtype(x1.dtype)
    in_itemsize = jnp.dtype(x1.dtype).itemsize
    use_mxu = _use_mxu(C1a, C1b)

    # --- HW tiling: 128-multiple tiles on a cdiv grid; never one giant tile ---------
    def per_tile_bytes(t):
        in_blk = (C1a + C1b) * t * in_itemsize
        out_blk = C2 * t * out_dtype.itemsize
        f32_tmp = 4 * C2 * t * 4            # dot results / y / fm f32 temporaries
        return 2 * (in_blk + out_blk) + f32_tmp   # double-buffered streams + temps

    if HW < 128:
        hw_tile = HW                          # block equals full (tiny) lane dim
    else:
        if hw_tile is None:
            hw_tile = 2048                    # good default; 4096 is fine on v5e/v6e
        hw_tile = int(min(hw_tile, pl.cdiv(HW, 128) * 128))
        hw_tile = max(128, (hw_tile // 128) * 128)
        while hw_tile > 128 and per_tile_bytes(hw_tile) > vmem_budget_bytes // 2:
            hw_tile = max(128, ((hw_tile // 2) // 128) * 128)
    n_hw = pl.cdiv(HW, hw_tile)
    hw_pad = n_hw * hw_tile
    mask_pool = (hw_pad != HW)

    # --- weights: fold BN scale into the bias-free conv, split for the fused concat --
    w1f = w1 * bn_scale
    w1a, w1b = w1f[:, :C1a], w1f[:, C1a:]
    if use_mxu:
        w1a = w1a.astype(jnp.bfloat16)
        w1b = w1b.astype(jnp.bfloat16)
    bn_shift = bn_shift.astype(jnp.float32)
    wse1 = wse1.astype(jnp.float32)
    wse2 = wse2.astype(jnp.float32)

    # --- fm VMEM cache decision (avoids phase-1 re-read / re-matmul of x1/x2) --------
    weight_bytes = (C2 * (C1a + C1b)) * (2 if use_mxu else 4) \
        + C2 * 4 + (2 * Cr * C2) * 4 + 2 * C2 * 4
    base_bytes = per_tile_bytes(hw_tile) + weight_bytes
    if base_bytes + C2 * hw_pad * 4 <= vmem_budget_bytes:
        use_cache, cache_dtype = True, jnp.float32
    elif base_bytes + C2 * hw_pad * 2 <= vmem_budget_bytes:
        use_cache, cache_dtype = True, jnp.bfloat16
    else:
        use_cache, cache_dtype = False, None
    cache_bytes = C2 * hw_pad * jnp.dtype(cache_dtype).itemsize if use_cache else 0
    vmem_limit = int(base_bytes + cache_bytes + (8 << 20))

    # Native NCHW -> (N, C, HW): free reshape, no transpose, no wrapper-side cast.
    x1r = x1.reshape(N, C1a, HW)
    x2r = x2.reshape(N, C1b, HW)

    kernel = functools.partial(
        _ffm_kernel, inv_hw=float(1.0 / HW), hw_true=HW, hw_tile=hw_tile,
        use_mxu=use_mxu, use_cache=use_cache, mask_pool=mask_pool)

    last = n_hw - 1
    if use_cache:
        # Phase 1 reads the cache: pin the x block index so no input DMA is issued.
        x_map = lambda n, p, k: (n, 0, k * (1 - p) + last * p)
    else:
        x_map = lambda n, p, k: (n, 0, k)

    scratch = [pltpu.VMEM((C2, 1), jnp.float32),   # pooled-sum accumulator
               pltpu.VMEM((C2, 1), jnp.float32)]   # (1 + se) per-batch scale
    if use_cache:
        scratch.append(pltpu.VMEM((C2, hw_pad), cache_dtype))

    # TODO(synk): v7x N==1 core-split (share HW across the 2 TensorCores with a CMEM
    # partial-pool exchange) not implemented; N is the only "parallel" axis today.
    out = pl.pallas_call(
        kernel,
        out_shape=jax.ShapeDtypeStruct((N, C2, HW), out_dtype),
        grid_spec=pltpu.PrefetchScalarGridSpec(
            num_scalar_prefetch=0,
            grid=(N, 2, n_hw),
            in_specs=[
                pl.BlockSpec((1, C1a, hw_tile), x_map),
                pl.BlockSpec((1, C1b, hw_tile), x_map),
                pl.BlockSpec((C2, C1a), lambda n, p, k: (0, 0)),
                pl.BlockSpec((C2, C1b), lambda n, p, k: (0, 0)),
                pl.BlockSpec((C2, 1), lambda n, p, k: (0, 0)),
                pl.BlockSpec((Cr, C2), lambda n, p, k: (0, 0)),
                pl.BlockSpec((C2, Cr), lambda n, p, k: (0, 0)),
            ],
            # Pool pass (p=0): output block pinned at (n,0,0) -> no HBM writebacks.
            # Apply pass (p=1): tile-indexed, lane-dense stores, each block written once.
            out_specs=pl.BlockSpec((1, C2, hw_tile), lambda n, p, k: (n, 0, k * p)),
            scratch_shapes=scratch,
        ),
        compiler_params=pltpu.CompilerParams(
            dimension_semantics=("parallel", "arbitrary", "arbitrary"),
            vmem_limit_bytes=vmem_limit,
        ),
    )(x1r, x2r, w1a, w1b, bn_shift, wse1, wse2)

    return out.reshape(N, C2, H, W)


def _reference(x1, x2, params, use_mxu=False, cache_dtype=jnp.float32):
    """Pure-JAX reference mirroring the module forward and the kernel's precision
    policy (BN scale folded into weights; bf16 MXU inputs when use_mxu; fm passed
    through the cache dtype before the SE scaling)."""
    N, C1a, H, W = x1.shape
    C1b = x2.shape[1]
    HW = H * W
    w1f = params["w1"] * params["bn_scale"]
    w1a, w1b = w1f[:, :C1a], w1f[:, C1a:]
    x1f = x1.reshape(N, C1a, HW)
    x2f = x2.reshape(N, C1b, HW)
    if use_mxu:
        w1a, w1b = w1a.astype(jnp.bfloat16), w1b.astype(jnp.bfloat16)
        x1f, x2f = x1f.astype(jnp.bfloat16), x2f.astype(jnp.bfloat16)
    y = (jnp.einsum("oc,ncl->nol", w1a, x1f, preferred_element_type=jnp.float32)
         + jnp.einsum("oc,ncl->nol", w1b, x2f, preferred_element_type=jnp.float32))
    fm = jnp.maximum(y + params["bn_shift"][None], 0.0)           # (N, C2, HW) f32
    pooled = jnp.mean(fm, axis=2, keepdims=True)                  # (N, C2, 1)
    h = jnp.maximum(jnp.einsum("rc,ncx->nrx", params["wse1"], pooled), 0.0)
    se = jax.nn.sigmoid(jnp.einsum("cr,nrx->ncx", params["wse2"], h))
    fm_c = fm.astype(cache_dtype).astype(jnp.float32)
    out = fm_c * (1.0 + se)
    return out.reshape(N, -1, H, W)


def init_params(key, c1, c2, reduction=1):
    cr = c2 // reduction
    k1, k2, k3, k4, k5 = jax.random.split(key, 5)
    # conv_1x1 weight (C2, C1): Conv2d(c1, c2, 1, bias=False) weight squeezed.
    w1 = jax.random.normal(k1, (c2, c1), jnp.float32) * 0.1
    gamma = 1.0 + 0.1 * jax.random.normal(k2, (c2, 1), jnp.float32)
    beta = 0.05 * jax.random.normal(k3, (c2, 1), jnp.float32)
    # fresh BN: running_mean=0, running_var=1, eps=1e-5 folded into scale/shift
    eps = 1e-5
    bn_scale = gamma / jnp.sqrt(1.0 + eps)
    bn_shift = beta
    # SE convs, bias=False: Conv2d(c2, cr, 1) -> (cr, c2); Conv2d(cr, c2, 1) -> (c2, cr)
    wse1 = jax.random.normal(k4, (cr, c2), jnp.float32) * 0.1
    wse2 = jax.random.normal(k5, (c2, cr), jnp.float32) * 0.1
    return {"w1": w1, "bn_scale": bn_scale, "bn_shift": bn_shift,
            "wse1": wse1, "wse2": wse2}


if __name__ == "__main__":
    key = jax.random.PRNGKey(0)
    k1, k2, k3, k4, k5 = jax.random.split(key, 5)

    N, H, W = 2, 16, 16

    # Case 1: tiny channel counts -> f32 VPU MAC path, f32 fm cache, 2 HW tiles.
    c1a, c1b, c2 = 2, 2, 8
    x1 = jax.random.normal(k1, (N, c1a, H, W), jnp.float32)
    x2 = jax.random.normal(k2, (N, c1b, H, W), jnp.float32)
    params = init_params(k3, c1a + c1b, c2, reduction=1)
    out = jax.block_until_ready(feature_fusion_module(x1, x2, params, hw_tile=128))
    ref = _reference(x1, x2, params, use_mxu=_use_mxu(c1a, c1b))
    assert out.shape == (N, c2, H, W), out.shape
    assert jnp.allclose(out, ref, atol=2e-3, rtol=2e-3), \
        float(jnp.max(jnp.abs(out - ref)))

    # Case 2: MXU path (in-kernel bf16 cast, f32 accumulation), fm cache, 2 HW tiles.
    c1a, c1b, c2 = 16, 16, 32
    x1 = jax.random.normal(k4, (N, c1a, H, W), jnp.float32)
    x2 = jax.random.normal(k5, (N, c1b, H, W), jnp.float32)
    params = init_params(k3, c1a + c1b, c2, reduction=2)
    out = jax.block_until_ready(feature_fusion_module(x1, x2, params, hw_tile=128))
    ref = _reference(x1, x2, params, use_mxu=_use_mxu(c1a, c1b))
    assert out.shape == (N, c2, H, W), out.shape
    assert jnp.allclose(out, ref, atol=2e-3, rtol=2e-3), \
        float(jnp.max(jnp.abs(out - ref)))

    print("KERNEL_OK")
</pallas_src>

<mosaic_0001>
module attributes {stable_mosaic.version = 11 : i64} {
  func.func @_ffm_kernel(%arg0: i32, %arg1: i32, %arg2: i32, %arg3: memref<1x2x128xf32, #tpu.memory_space<vmem>>, %arg4: memref<1x2x128xf32, #tpu.memory_space<vmem>>, %arg5: memref<8x2xf32, #tpu.memory_space<vmem>>, %arg6: memref<8x2xf32, #tpu.memory_space<vmem>>, %arg7: memref<8x1xf32, #tpu.memory_space<vmem>>, %arg8: memref<8x8xf32, #tpu.memory_space<vmem>>, %arg9: memref<8x8xf32, #tpu.memory_space<vmem>>, %arg10: memref<1x8x128xf32, #tpu.memory_space<vmem>>, %arg11: memref<8x1xf32, #tpu.memory_space<vmem>>, %arg12: memref<8x1xf32, #tpu.memory_space<vmem>>, %arg13: memref<8x256xf32, #tpu.memory_space<vmem>>) attributes {dimension_semantics = [#tpu.dimension_semantics<parallel>, #tpu.dimension_semantics<arbitrary>, #tpu.dimension_semantics<arbitrary>], iteration_bounds = array<i64: 2, 2, 2>, scalar_prefetch = 0 : i64, scratch_operands = 3 : i64, tpu.core_type = #tpu.core_type<tc>, window_params = [{transform_indices = @transform_0, window_bounds = array<i64: 1, 2, 128>}, {transform_indices = @transform_1, window_bounds = array<i64: 1, 2, 128>}, {pipeline_mode = #tpu.pipeline_mode<synchronous>, transform_indices = @transform_2, window_bounds = array<i64: 8, 2>}, {pipeline_mode = #tpu.pipeline_mode<synchronous>, transform_indices = @transform_3, window_bounds = array<i64: 8, 2>}, {pipeline_mode = #tpu.pipeline_mode<synchronous>, transform_indices = @transform_4, window_bounds = array<i64: 8, 1>}, {pipeline_mode = #tpu.pipeline_mode<synchronous>, transform_indices = @transform_5, window_bounds = array<i64: 8, 8>}, {pipeline_mode = #tpu.pipeline_mode<synchronous>, transform_indices = @transform_6, window_bounds = array<i64: 8, 8>}, {transform_indices = @transform_7, window_bounds = array<i64: 1, 8, 128>}]} {
    %c0_i32 = arith.constant 0 : i32
    %0 = arith.cmpi eq, %arg1, %c0_i32 : i32
    %c0_i32_0 = arith.constant 0 : i32
    %1 = arith.cmpi eq, %arg2, %c0_i32_0 : i32
    %2 = arith.andi %0, %1 : i1
    %3 = arith.extui %2 : i1 to i32
    %c0_i32_1 = arith.constant 0 : i32
    %4 = arith.cmpi ne, %3, %c0_i32_1 : i32
    scf.if %4 {
      %cst = arith.constant 0.000000e+00 : f32
      %16 = vector.broadcast %cst : f32 to vector<8x1xf32>
      %c0 = arith.constant 0 : index
      %c0_8 = arith.constant 0 : index
      %17 = vector.load %arg11[%c0, %c0_8] : memref<8x1xf32, #tpu.memory_space<vmem>>, vector<8x1xf32>
      tpu.vector_store %arg11[%c0, %c0_8], %16 {strides = array<i32>} : memref<8x1xf32, #tpu.memory_space<vmem>>, vector<8x1xf32>,
      %cst_9 = arith.constant 0.000000e+00 : f32
      %18 = vector.broadcast %cst_9 : f32 to vector<1x8x128xf32>
      %c0_10 = arith.constant 0 : index
      %c0_11 = arith.constant 0 : index
      %c0_12 = arith.constant 0 : index
      %19 = vector.load %arg10[%c0_10, %c0_11, %c0_12] : memref<1x8x128xf32, #tpu.memory_space<vmem>>, vector<1x8x128xf32>
      tpu.vector_store %arg10[%c0_10, %c0_11, %c0_12], %18 {strides = array<i32>} : memref<1x8x128xf32, #tpu.memory_space<vmem>>, vector<1x8x128xf32>,
    } else {
    }
    %c0_i32_2 = arith.constant 0 : i32
    %5 = arith.cmpi eq, %arg1, %c0_i32_2 : i32
    %6 = arith.extui %5 : i1 to i32
    %c0_i32_3 = arith.constant 0 : i32
    %7 = arith.cmpi ne, %6, %c0_i32_3 : i32
    scf.if %7 {
      %c0 = arith.constant 0 : index
      %c0_8 = arith.constant 0 : index
      %c0_9 = arith.constant 0 : index
      %16 = vector.load %arg3[%c0, %c0_8, %c0_9] : memref<1x2x128xf32, #tpu.memory_space<vmem>>, vector<1x2x128xf32>
      %17 = vector.shape_cast %16 : vector<1x2x128xf32> to vector<2x128xf32>
      %c0_10 = arith.constant 0 : index
      %c0_11 = arith.constant 0 : index
      %c0_12 = arith.constant 0 : index
      %18 = vector.load %arg4[%c0_10, %c0_11, %c0_12] : memref<1x2x128xf32, #tpu.memory_space<vmem>>, vector<1x2x128xf32>
      %19 = vector.shape_cast %18 : vector<1x2x128xf32> to vector<2x128xf32>
      %c0_13 = arith.constant 0 : index
      %c0_14 = arith.constant 0 : index
      %20 = vector.load %arg5[%c0_13, %c0_14] : memref<8x2xf32, #tpu.memory_space<vmem>>, vector<8x2xf32>
      %c0_15 = arith.constant 0 : index
      %c0_16 = arith.constant 0 : index
      %21 = vector.load %arg6[%c0_15, %c0_16] : memref<8x2xf32, #tpu.memory_space<vmem>>, vector<8x2xf32>
      %cst = arith.constant 0.000000e+00 : f32
      %22 = vector.broadcast %cst : f32 to vector<8x128xf32>
      %23 = vector.extract_strided_slice %20 {offsets = [0, 0], sizes = [8, 1], strides = [1, 1]} : vector<8x2xf32> to vector<8x1xf32>
      %24 = vector.extract_strided_slice %17 {offsets = [0, 0], sizes = [1, 128], strides = [1, 1]} : vector<2x128xf32> to vector<1x128xf32>
      %25 = vector.broadcast %23 : vector<8x1xf32> to vector<8x128xf32>
      %26 = vector.broadcast %24 : vector<1x128xf32> to vector<8x128xf32>
      %27 = arith.mulf %25, %26 : vector<8x128xf32>
      %28 = arith.addf %22, %27 : vector<8x128xf32>
      %29 = vector.extract_strided_slice %20 {offsets = [0, 1], sizes = [8, 1], strides = [1, 1]} : vector<8x2xf32> to vector<8x1xf32>
      %30 = vector.extract_strided_slice %17 {offsets = [1, 0], sizes = [1, 128], strides = [1, 1]} : vector<2x128xf32> to vector<1x128xf32>
      %31 = vector.broadcast %29 : vector<8x1xf32> to vector<8x128xf32>
      %32 = vector.broadcast %30 : vector<1x128xf32> to vector<8x128xf32>
      %33 = arith.mulf %31, %32 : vector<8x128xf32>
      %34 = arith.addf %28, %33 : vector<8x128xf32>
      %35 = vector.extract_strided_slice %21 {offsets = [0, 0], sizes = [8, 1], strides = [1, 1]} : vector<8x2xf32> to vector<8x1xf32>
      %36 = vector.extract_strided_slice %19 {offsets = [0, 0], sizes = [1, 128], strides = [1, 1]} : vector<2x128xf32> to vector<1x128xf32>
      %37 = vector.broadcast %35 : vector<8x1xf32> to vector<8x128xf32>
      %38 = vector.broadcast %36 : vector<1x128xf32> to vector<8x128xf32>
      %39 = arith.mulf %37, %38 : vector<8x128xf32>
      %40 = arith.addf %34, %39 : vector<8x128xf32>
      %41 = vector.extract_strided_slice %21 {offsets = [0, 1], sizes = [8, 1], strides = [1, 1]} : vector<8x2xf32> to vector<8x1xf32>
      %42 = vector.extract_strided_slice %19 {offsets = [1, 0], sizes = [1, 128], strides = [1, 1]} : vector<2x128xf32> to vector<1x128xf32>
      %43 = vector.broadcast %41 : vector<8x1xf32> to vector<8x128xf32>
      %44 = vector.broadcast %42 : vector<1x128xf32> to vector<8x128xf32>
      %45 = arith.mulf %43, %44 : vector<8x128xf32>
      %46 = arith.addf %40, %45 : vector<8x128xf32>
      %c0_17 = arith.constant 0 : index
      %c0_18 = arith.constant 0 : index
      %47 = vector.load %arg7[%c0_17, %c0_18] : memref<8x1xf32, #tpu.memory_space<vmem>>, vector<8x1xf32>
      %48 = vector.broadcast %47 : vector<8x1xf32> to vector<8x128xf32>
      %49 = arith.addf %46, %48 : vector<8x128xf32>
      %cst_19 = arith.constant 0.000000e+00 : f32
      %50 = vector.broadcast %cst_19 : f32 to vector<8x128xf32>
      %51 = arith.maximumf %49, %50 : vector<8x128xf32>
      %c0_20 = arith.constant 0 : index
      %c0_21 = arith.constant 0 : index
      %52 = vector.load %arg11[%c0_20, %c0_21] : memref<8x1xf32, #tpu.memory_space<vmem>>, vector<8x1xf32>
      %cst_22 = arith.constant dense<0.000000e+00> : vector<8xf32>
      %53 = vector.multi_reduction <add>, %51, %cst_22 [1] : vector<8x128xf32> to vector<8xf32>
      %54 = vector.shape_cast %53 : vector<8xf32> to vector<8x1xf32>
      %55 = arith.addf %52, %54 : vector<8x1xf32>
      %c0_23 = arith.constant 0 : index
      %c0_24 = arith.constant 0 : index
      %56 = vector.load %arg11[%c0_23, %c0_24] : memref<8x1xf32, #tpu.memory_space<vmem>>, vector<8x1xf32>
      tpu.vector_store %arg11[%c0_23, %c0_24], %55 {strides = array<i32>} : memref<8x1xf32, #tpu.memory_space<vmem>>, vector<8x1xf32>,
      %c128_i32 = arith.constant 128 : i32
      %57 = arith.muli %arg2, %c128_i32 : i32
      %58 = tpu.assume_multiple %57, 128 : i32
      %c0_25 = arith.constant 0 : index
      %59 = arith.index_cast %58 : i32 to index
      %60 = vector.load %arg13[%c0_25, %59] : memref<8x256xf32, #tpu.memory_space<vmem>>, vector<8x128xf32>
      tpu.vector_store %arg13[%c0_25, %59], %51 {strides = array<i32>} : memref<8x256xf32, #tpu.memory_space<vmem>>, vector<8x128xf32>,
    } else {
    }
    %c0_i32_4 = arith.constant 0 : i32
    %8 = arith.cmpi eq, %arg1, %c0_i32_4 : i32
    %c1_i32 = arith.constant 1 : i32
    %9 = arith.cmpi eq, %arg2, %c1_i32 : i32
    %10 = arith.andi %8, %9 : i1
    %11 = arith.extui %10 : i1 to i32
    %c0_i32_5 = arith.constant 0 : i32
    %12 = arith.cmpi ne, %11, %c0_i32_5 : i32
    scf.if %12 {
      %c0 = arith.constant 0 : index
      %c0_8 = arith.constant 0 : index
      %16 = vector.load %arg11[%c0, %c0_8] : memref<8x1xf32, #tpu.memory_space<vmem>>, vector<8x1xf32>
      %cst = arith.constant 3.906250e-03 : f32
      %17 = vector.broadcast %cst : f32 to vector<8x1xf32>
      %18 = arith.mulf %16, %17 : vector<8x1xf32>
      %c0_9 = arith.constant 0 : index
      %c0_10 = arith.constant 0 : index
      %19 = vector.load %arg8[%c0_9, %c0_10] : memref<8x8xf32, #tpu.memory_space<vmem>>, vector<8x8xf32>
      %cst_11 = arith.constant dense<0.000000e+00> : vector<8x1xf32>
      %20 = tpu.matmul %19, %18, %cst_11 {dimension_numbers = #tpu.dot_dimension_numbers<[1], [0], [0], [1], [0, 0, 1, 1], [], []>} : vector<8x8xf32>, vector<8x1xf32>, vector<8x1xf32> -> vector<8x1xf32>
      %cst_12 = arith.constant 0.000000e+00 : f32
      %21 = vector.broadcast %cst_12 : f32 to vector<8x1xf32>
      %22 = arith.maximumf %20, %21 : vector<8x1xf32>
      %c0_13 = arith.constant 0 : index
      %c0_14 = arith.constant 0 : index
      %23 = vector.load %arg9[%c0_13, %c0_14] : memref<8x8xf32, #tpu.memory_space<vmem>>, vector<8x8xf32>
      %cst_15 = arith.constant dense<0.000000e+00> : vector<8x1xf32>
      %24 = tpu.matmul %23, %22, %cst_15 {dimension_numbers = #tpu.dot_dimension_numbers<[1], [0], [0], [1], [0, 0, 1, 1], [], []>} : vector<8x8xf32>, vector<8x1xf32>, vector<8x1xf32> -> vector<8x1xf32>
      %25 = arith.negf %24 : vector<8x1xf32>
      %26 = math.exp %25 : vector<8x1xf32>
      %cst_16 = arith.constant 1.000000e+00 : f32
      %27 = vector.broadcast %cst_16 : f32 to vector<8x1xf32>
      %28 = arith.addf %27, %26 : vector<8x1xf32>
      %29 = arith.divf %27, %28 : vector<8x1xf32>
      %cst_17 = arith.constant 1.000000e+00 : f32
      %30 = vector.broadcast %cst_17 : f32 to vector<8x1xf32>
      %31 = arith.addf %30, %29 : vector<8x1xf32>
      %c0_18 = arith.constant 0 : index
      %c0_19 = arith.constant 0 : index
      %32 = vector.load %arg12[%c0_18, %c0_19] : memref<8x1xf32, #tpu.memory_space<vmem>>, vector<8x1xf32>
      tpu.vector_store %arg12[%c0_18, %c0_19], %31 {strides = array<i32>} : memref<8x1xf32, #tpu.memory_space<vmem>>, vector<8x1xf32>,
    } else {
    }
    %c1_i32_6 = arith.constant 1 : i32
    %13 = arith.cmpi eq, %arg1, %c1_i32_6 : i32
    %14 = arith.extui %13 : i1 to i32
    %c0_i32_7 = arith.constant 0 : i32
    %15 = arith.cmpi ne, %14, %c0_i32_7 : i32
    scf.if %15 {
      %c128_i32 = arith.constant 128 : i32
      %16 = arith.muli %arg2, %c128_i32 : i32
      %17 = tpu.assume_multiple %16, 128 : i32
      %c0 = arith.constant 0 : index
      %18 = arith.index_cast %17 : i32 to index
      %19 = vector.load %arg13[%c0, %18] : memref<8x256xf32, #tpu.memory_space<vmem>>, vector<8x128xf32>
      %c0_8 = arith.constant 0 : index
      %c0_9 = arith.constant 0 : index
      %20 = vector.load %arg12[%c0_8, %c0_9] : memref<8x1xf32, #tpu.memory_space<vmem>>, vector<8x1xf32>
      %21 = vector.broadcast %20 : vector<8x1xf32> to vector<8x128xf32>
      %22 = arith.mulf %19, %21 : vector<8x128xf32>
      %c0_10 = arith.constant 0 : index
      %c0_11 = arith.constant 0 : index
      %c0_12 = arith.constant 0 : index
      %23 = vector.load %arg10[%c0_10, %c0_11, %c0_12] : memref<1x8x128xf32, #tpu.memory_space<vmem>>, vector<1x8x128xf32>
      %24 = vector.shape_cast %23 : vector<1x8x128xf32> to vector<8x128xf32>
      %25 = vector.shape_cast %22 : vector<8x128xf32> to vector<1x8x128xf32>
      tpu.vector_store %arg10[%c0_10, %c0_11, %c0_12], %25 {strides = array<i32>} : memref<1x8x128xf32, #tpu.memory_space<vmem>>, vector<1x8x128xf32>,
    } else {
    }
    return
  }
  func.func @transform_0(%arg0: i32, %arg1: i32, %arg2: i32) -> (i32, i32, i32) {
    %c1_i32 = arith.constant 1 : i32
    %0 = arith.subi %c1_i32, %arg1 : i32
    %1 = arith.muli %arg2, %0 : i32
    %c1_i32_0 = arith.constant 1 : i32
    %2 = arith.muli %c1_i32_0, %arg1 : i32
    %3 = arith.addi %1, %2 : i32
    %c0_i32 = arith.constant 0 : i32
    %c0_i32_1 = arith.constant 0 : i32
    return %arg0, %c0_i32, %3 : i32, i32, i32
  }
  func.func @transform_1(%arg0: i32, %arg1: i32, %arg2: i32) -> (i32, i32, i32) {
    %c1_i32 = arith.constant 1 : i32
    %0 = arith.subi %c1_i32, %arg1 : i32
    %1 = arith.muli %arg2, %0 : i32
    %c1_i32_0 = arith.constant 1 : i32
    %2 = arith.muli %c1_i32_0, %arg1 : i32
    %3 = arith.addi %1, %2 : i32
    %c0_i32 = arith.constant 0 : i32
    %c0_i32_1 = arith.constant 0 : i32
    return %arg0, %c0_i32, %3 : i32, i32, i32
  }
  func.func @transform_2(%arg0: i32, %arg1: i32, %arg2: i32) -> (i32, i32) {
    %c0_i32 = arith.constant 0 : i32
    %c0_i32_0 = arith.constant 0 : i32
    %c0_i32_1 = arith.constant 0 : i32
    return %c0_i32, %c0_i32_0 : i32, i32
  }
  func.func @transform_3(%arg0: i32, %arg1: i32, %arg2: i32) -> (i32, i32) {
    %c0_i32 = arith.constant 0 : i32
    %c0_i32_0 = arith.constant 0 : i32
    %c0_i32_1 = arith.constant 0 : i32
    return %c0_i32, %c0_i32_0 : i32, i32
  }
  func.func @transform_4(%arg0: i32, %arg1: i32, %arg2: i32) -> (i32, i32) {
    %c0_i32 = arith.constant 0 : i32
    %c0_i32_0 = arith.constant 0 : i32
    %c0_i32_1 = arith.constant 0 : i32
    return %c0_i32, %c0_i32_0 : i32, i32
  }
  func.func @transform_5(%arg0: i32, %arg1: i32, %arg2: i32) -> (i32, i32) {
    %c0_i32 = arith.constant 0 : i32
    %c0_i32_0 = arith.constant 0 : i32
    %c0_i32_1 = arith.constant 0 : i32
    return %c0_i32, %c0_i32_0 : i32, i32
  }
  func.func @transform_6(%arg0: i32, %arg1: i32, %arg2: i32) -> (i32, i32) {
    %c0_i32 = arith.constant 0 : i32
    %c0_i32_0 = arith.constant 0 : i32
    %c0_i32_1 = arith.constant 0 : i32
    return %c0_i32, %c0_i32_0 : i32, i32
  }
  func.func @transform_7(%arg0: i32, %arg1: i32, %arg2: i32) -> (i32, i32, i32) {
    %0 = arith.muli %arg2, %arg1 : i32
    %c0_i32 = arith.constant 0 : i32
    %c0_i32_0 = arith.constant 0 : i32
    return %arg0, %c0_i32, %0 : i32, i32, i32
  }
}

</mosaic_0001>

<bundles_post_ra>
// kernel: tpu_custom_call.1
= control target key start
LH: loop header
LB: loop body
LE: loop exit
PB: predicated region body
PF: predicated region fallthrough
CT: control target
= control target key end

     0   :  { %12 = vsyncpa [#allocation6], 0  ;;  %s1269_s0 = inlined_call_operand.vmem [shape: f32[2,2,256], index: 0, kind: input, shape index: {}]   ;;  %s1270_s1 = inlined_call_operand.vmem [shape: f32[2,2,256], index: 1, kind: input, shape index: {}]   ;;  %s1271_s2 = inlined_call_operand.vmem [shape: f32[8,2], index: 2, kind: input, shape index: {}]   ;;  %s1272_s3 = inlined_call_operand.vmem [shape: f32[8,2], index: 3, kind: input, shape index: {}]   ;;  %s1273_s4 = inlined_call_operand.vmem [shape: f32[8,1], index: 4, kind: input, shape index: {}]   ;;  %s1274_s5 = inlined_call_operand.vmem [shape: f32[8,8], index: 5, kind: input, shape index: {}]   ;;  %s1275_s6 = inlined_call_operand.vmem [shape: f32[8,8], index: 6, kind: input, shape index: {}]   ;;  %s1276_s7 = inlined_call_operand.hbm [shape: f32[2,8,256], index: 7, kind: output, shape index: {}]  }
   0x1   :  { %14 = vsyncpa [#allocation6 + $0x1], 0  ;;  %s1071_s24 = smov 0   ;;  %s1073_s25 = smov 0  }
   0x2   :  { %s1075_s26 = smov 0   ;;  %s1077_s27 = smov 0  }
   0x3   :  { %s1079_s28 = smov 0   ;;  %s1081_s29 = smov 0  }
   0x4   :  { %s1083_s30 = smov 0   ;;  %s1085_s8 = smov 0  }
   0x5   :  { %s1087_s9 = smov 0   ;;  %s1089_s10 = smov 0  }
   0x6 LB: > { %1284 = sst [smem:[#allocation8_spill]] %s1010_s30  ;;  %s770_s11 = sadd.s32 4294967295, %s1022_s10   ;;  %s1022_s10 = sphi %s1089_s10, %s20_s10   ;;  %s1018_s9 = sphi %s1087_s9, %s1298_s9   ;;  %s1014_s8 = sphi %s1085_s8, %s1297_s8   ;;  %s1010_s30 = sphi %s1083_s30, %s1296_s30   ;;  %s1006_s29 = sphi %s1081_s29, %s1295_s29   ;;  %s1002_s28 = sphi %s1079_s28, %s1294_s28   ;;  %s998_s27 = sphi %s1077_s27, %s1293_s27   ;;  %s994_s26 = sphi %s1075_s26, %s1301_s26   ;;  %s990_s25 = sphi %s1073_s25, %s1300_s25   ;;  %s986_s24 = sphi %s1071_s24, %s1299_s24  }
   0x7   : > { %1285 = sst [smem:[#allocation9_spill]] %s1014_s8  ;;  %s771_s12 = sadd.s32 4294967294, %s1022_s10  }
   0x8   : > { %1286 = sst [smem:[#allocation10_spill]] %s1018_s9  ;;  %s32_s13 = sadd.s32 1, %s1010_s30 }
   0x9   : > { %p33_p0 = scmp.ge.s32.totalorder %s32_s13, 2  ;;  %s35_s14 = sadd.s32 1, %s1014_s8 }
   0xa   : > { %s39_s15 = sadd.s32 1, %s1018_s9  ;;  %s216_s16 = smul.u32 %s1010_s30, %s1014_s8 }
   0xb   : > { %s1303_s13 = smov (%p33_p0, %s32_s13), 0  ;;  %s1305_s14 = smov (!%p33_p0, %s35_s14), %s1014_s8 }
   0xc   : > { %1287 = sst [smem:[#allocation11_spill]] %s1303_s13  ;;  %p233_p1 = scmp.ne.s32.totalorder %s994_s26, %s990_s25 }
   0xd   : > { %p234_p2 = scmp.eq.s32.totalorder %s770_s11, 7  ;;  %p37_p3 = scmp.ge.s32.totalorder %s1305_s14, 2 }
   0xe   : > { %p239_p4 = scmp.ne.s32.totalorder %s990_s25, %s986_s24  ;;  %p240_p6 = scmp.eq.s32.totalorder %s771_s12, 7 }
   0xf   : > { %p1135_p5 = por %p234_p2, %p233_p1  ;;  %s1307_s14 = smov (%p37_p3, %s1305_s14), 0 }
  0x10   : > { %1289 = sst [smem:[#allocation12_spill]] %s1307_s14  ;;  %s1309_s15 = smov (!%p37_p3, %s39_s15), %s1018_s9 }
  0x11   : > { %s217_s18 = smul.u32 %s1307_s14, %s1303_s13  ;;  %p1144_p7 = por %p240_p6, %p239_p4 }
  0x12   : > { %p41_p8 = scmp.ge.s32.totalorder %s1309_s15, 2  ;;  %p774_p9 = scmp.ge.s32.totalorder %s1022_s10, 1 }
  0x13   : > { %s219_s20 = ssub.s32 %s216_s16, %s217_s18  ;;  %p307_p10 = scmp.lt.s32.totalorder %s1022_s10, 9 }
  0x14   : > { %s1311_s15 = smov (%p41_p8, %s1309_s15), 0  ;;  %s223_s23 = sadd.s32 1, %s994_s26 }
  0x15   : > { %1291 = sst [smem:[#allocation13_spill]] %s1311_s15  ;;  %p308_p11 = pnand %p774_p9, %p307_p10 }
  0x16   : > { %s218_s21 = ssub.s32 %s1018_s9, %s1311_s15  ;;  %s1283_s12 = sand.u32 (!%p308_p11), 1, %s990_s25  }
  0x17   : > { %s220_s22 = sor.u32 %s219_s20, %s218_s21  ;;  %311 = sbr.rel (%p308_p11) target bundleno = 964 (0x3c4), region = 48 }
  0x18   : > { %p221_p12 = scmp.eq.s32.totalorder %s220_s22, 0  ;;  %s356_s16 = ssub.s32 (!%p308_p11), 1, %s1002_s28 }
  0x19   : > { %s775_s18 = sshll.u32 (!%p308_p11), %s1283_s12, 3  ;;  %s357_s20 = smul.u32 (!%p308_p11), %s998_s27, %s356_s16 }
  0x1a   : > { %s1156_s11 = scalar_select %p221_p12, %s994_s26, %s223_s23  }
  0x1b   : > { %p359_p13 = scmp.lt.s32.totalorder (!%p308_p11), %s1006_s29, 1  ;;  %s358_s21 = sadd.s32 (!%p308_p11), %s1002_s28, %s357_s20 }
  0x1c   : > { %p385_p0 = scmp.eq.s32.totalorder (!%p308_p11), %s1002_s28, 0  ;;  %p361_p1 = scmp.lt.s32.totalorder (!%p308_p11), %s358_s21, 1 }
  0x1d   : > { %p386_p2 = scmp.eq.s32.totalorder (!%p308_p11), %s998_s27, 0  ;;  %s1180_s20 = scalar_lea.vmem (!%p308_p11), [#allocation5], %s775_s18 }
  0x1e   : > { %s360_s22 = scalar_select %p359_p13, %s1006_s29, 1 }
  0x1f   : > { %s1313_s21 = smov (!%p361_p1, %s358_s21), 1  ;;  %p387_p3 = pnand %p386_p2, %p385_p0 }
  0x20   : > { %s776_s23 = sshll.u32 %s360_s22, 1  ;;  %vm391_vm0 = vcmask (!%p387_p3), 7168   ;;  %v1024_v0 = vmov (!%p387_p3), 0.0  }
  0x21   : > { %s364_s15 = sadd.s32 %s776_s23, %s1313_s21  ;;  %390 = sbr.rel (%p387_p3) target bundleno = 40 (0x28), region = 52  ;;  %392 = vst.msk [vmem:[#allocation2] sm:$0xff] (!%p387_p3), %vm391_vm0, %v1024_v0  ;;  %393 = vst [vmem:[%s1180_s20] sm:$0xff] (!%p387_p3), %v1024_v0 }
  0x22   : > { %s777_s14 = sshll.u32 %s364_s15, 1 }
  0x23   : > { %s1173_s8 = scalar_lea.vmem %s1269_s0, %s777_s14  ;;  %s1178_s16 = scalar_lea.vmem %s1270_s1, %s777_s14 }
  0x28 PF: > { %p780_p4 = scmp.ne.s32.totalorder %s1002_s28, 0 }
  0x29   : > { %v399_v1 = vld [vmem:[%s1271_s2] sm:$0xff] (!%p780_p4)  ;;  %v1025_v3 = vmov (!%p780_p4), 0   ;;  %v1026_v4 = vmov (!%p780_p4), 1   ;;  %v406_v6 = vlaneseq (!%p780_p4)  ;;  %s781_s18 = sshll.u32 (!%p780_p4), %s998_s27, 7  ;;  %vm455_vm1 = vcmask (!%p780_p4), 7168  }
  0x2a   : > { %396 = sbr.rel (%p780_p4) target bundleno = 333 (0x14d), region = 56  ;;  %v400_v2 = vld [vmem:[%s1272_s3] sm:$0xff] (!%p780_p4)  ;;  %901 = vset.pattern.permute.xlu0 (!%p780_p4), %v1025_v3  ;;  %903 = vset.pattern.permute.xlu1 (!%p780_p4), %v1025_v3  ;;  %s458_s21 = sshra.s32 (!%p780_p4), %s781_s18, 7 }
  0x2b   : > { %403 = vperm.xlu0 (!%p780_p4), %901, %v399_v1   ;;  %424 = vperm.xlu1 (!%p780_p4), %903, %v400_v2   ;;  %v443_v5 = vld [vmem:[%s1273_s4] sm:$0xff] (!%p780_p4)  ;;  %v407_v7 = vshrl.u32 (!%p780_p4), %v406_v6, 7  ;;  %s782_s22 = sshll.u32 (!%p780_p4), %s458_s21, 3 }
  0x2c   : > { %v397_v10 = vld [vmem:[%s1173_s8] sm:$0x3] (!%p780_p4)  ;;  %s461_s8 = scalar_lea.vmem (!%p780_p4), [#allocation4], %s782_s22 }
  0x2d   : > { %v408_v8 = vsub.s32 (!%p780_p4), 0, %v407_v7  ;;  %v418_v9 = vsub.s32 (!%p780_p4), 1, %v407_v7  ;;  %v398_v13 = vld [vmem:[%s1178_s16] sm:$0x3] (!%p780_p4) }
  0x2e   : > { %v451_v30 = vld [vmem:[#allocation2] sm:$0xff] (!%p780_p4) }
  0x2f   : > { %902 = vset.pattern.permute.xlu0 (!%p780_p4), %v1026_v4  ;;  %904 = vset.pattern.permute.xlu1 (!%p780_p4), %v1026_v4  ;;  %v409_v14 = vrot.slane (!%p780_p4), %v397_v10, %v408_v8  ;;  %v419_v15 = vrot.slane (!%p780_p4), %v397_v10, %v418_v9  ;;  %v430_v16 = vrot.slane (!%p780_p4), %v398_v13, %v408_v8 }
  0x30   : > { %413 = vperm.xlu0 (!%p780_p4), %902, %v399_v1   ;;  %434 = vperm.xlu1 (!%p780_p4), %904, %v400_v2   ;;  %v440_v17 = vrot.slane (!%p780_p4), %v398_v13, %v418_v9 }
  0x34   : > { %905 = vset.pattern.permute.xlu1 %v1025_v3  ;;  %906 = vset.pattern.permute.xlu0 %v1025_v3 }
  0x35   : > { %446 = vperm.xlu1 %905, %v443_v5  }
  0xaa   : > { %v404_v11 = vpop.permute.xlu0 %403  ;;  %v425_v12 = vpop.permute.xlu1 %424 }
  0xab   : > { %v410_v20 = vmul.f32 %v409_v14, %v404_v11  ;;  %v431_v22 = vmul.f32 %v430_v16, %v425_v12 }
  0xaf   : > { %v414_v18 = vpop.permute.xlu0 %413  ;;  %v435_v19 = vpop.permute.xlu1 %434 }
  0xb0   : > { %v420_v21 = vmul.f32 %v419_v15, %v414_v18  ;;  %v441_v24 = vmul.f32 %v440_v17, %v435_v19 }
  0xb2   : > { %v421_v23 = vadd.f32 %v420_v21, %v410_v20 }
  0xb4   : > { %v432_v25 = vadd.f32 %v431_v22, %v421_v23  ;;  %v447_v26 = vpop.permute.xlu1 %446 }
  0xb6   : > { %v442_v27 = vadd.f32 %v441_v24, %v432_v25 }
  0xb8   : > { %v449_v28 = vadd.f32 %v447_v26, %v442_v27 }
  0xba   : > { %v450_v29 = vmax.f32 %v449_v28, 0.0 }
  0xbc   : > { %462 = vst [vmem:[%s461_s8] sm:$0xff] %v450_v29  ;;  %452 = vadd.xlane.f32.xlu0 %v450_v29 }
 0x149   : > { %v453_v31 = vpop.xlane.xlu0 %452 }
 0x14a   : > { %v454_v32 = vadd.f32 %v453_v31, %v451_v30 }
 0x14c   : > { %456 = vst.msk [vmem:[#allocation2] sm:$0xff] %vm455_vm1, %v454_v32 }
 0x14d PF: > { %p463_p6 = scmp.eq.s32.totalorder %s998_s27, 1 }
 0x14f   : > { %p464_p8 = pnand %p463_p6, %p385_p0 }
 0x150   : > { %v1027_v34 = vmov (!%p464_p8), 0.0   ;;  %vm1028_vm2 = vmmov (!%p464_p8), 0   ;;  %v470_v36 = vld [vmem:[%s1274_s5] sm:$0xff] (!%p464_p8)  ;;  %vm471_vm3 = vcmask (!%p464_p8), 64512   ;;  %vm627_vm4 = vcmask (!%p464_p8), 7168  }
 0x151   : > { %467 = sbr.rel (%p464_p8) target bundleno = 799 (0x31f), region = 60  ;;  %798 = vmatprep.subr.mxu0 (!%p464_p8), %v1027_v34  ;;  %800 = vmatprep.mubr.msk.f32.mxu0 (!%p464_p8), %vm1028_vm2, %v1027_v34  ;;  %v546_v40 = vld [vmem:[%s1275_s6] sm:$0xff] (!%p464_p8) }
 0x152   : > { %803 = vmatprep.subr.mxu1 (!%p464_p8), %v1027_v34  ;;  %805 = vmatprep.mubr.msk.f32.mxu1 (!%p464_p8), %vm1028_vm2, %v1027_v34 }
 0x153   : > { %v468_v33 = vld [vmem:[#allocation2] sm:$0xff] (!%p464_p8) }
 0x154   : > { %v469_v35 = vmul.f32 (!%p464_p8), 0.00390625, %v468_v33 }
 0x156   : > { %799 = vmatpush3.msra.mxu0 (!%p464_p8), %v469_v35 }
 0x157   : > { %801 = vmatmul.mubr.msk.f32.vlgmr.msra.gmra.mrb[0].mxu0 (!%p464_p8), %vm471_vm3, %v470_v36 }
 0x22a   : > { %v541_v37 = vpop.f32.mrb[0].mxu0 }
 0x22b   : > { %v545_v38 = vmax.f32 %v541_v37, 0.0  ;;  %v802_v39 = vpop.f32.mrb[1].mxu0 }
 0x22d   : > { %804 = vmatpush3.msra.mxu1 %v545_v38 }
 0x22e   : > { %806 = vmatmul.mubr.msk.f32.vlgmr.msra.gmra.mrb[0].mxu1 %vm471_vm3, %v546_v40 }
 0x301   : > { %v616_v41 = vpop.f32.mrb[0].mxu1 }
 0x302   : > { %v785_v42 = vmul.f32 -1.442695, %v616_v41  ;;  %v807_v43 = vpop.f32.mrb[1].mxu1 }
 0x304   : > { %907 = vpow2.f32 %v785_v42 }
 0x30e   : > { %v908_v44 = vpop.eup %907 }
 0x30f   : > { %v623_v45 = vadd.f32 1.0, %v908_v44 }
 0x311   : > { %909 = vrcp.f32 %v623_v45 }
 0x31b   : > { %v910_v46 = vpop.eup %909 }
 0x31c   : > { %v626_v47 = vadd.f32 1.0, %v910_v46 }
 0x31e   : > { %628 = vst.msk [vmem:[#allocation3] sm:$0xff] %vm627_vm4, %v626_v47 }
 0x31f PF: > { %p786_p9 = scmp.ne.s32.totalorder %s1002_s28, 1 }
 0x320   : > { %v1029_v49 = vmov (!%p786_p9), 0   ;;  %s787_s15 = sshll.u32 (!%p786_p9), %s998_s27, 7 }
 0x321   : > { %632 = sbr.rel (%p786_p9) target bundleno = 937 (0x3a9), region = 64  ;;  %911 = vset.pattern.permute.xlu0 (!%p786_p9), %v1029_v49  ;;  %s634_s30 = sshra.s32 (!%p786_p9), %s787_s15, 7 }
 0x322   : > { %s788_s14 = sshll.u32 (!%p786_p9), %s634_s30, 3 }
 0x323   : > { %s637_s12 = scalar_lea.vmem (!%p786_p9), [#allocation4], %s788_s14 }
 0x324   : > { %v638_v50 = vld [vmem:[%s637_s12] sm:$0xff] (!%p786_p9) }
 0x325   : > { %v639_v48 = vld [vmem:[#allocation3] sm:$0xff] (!%p786_p9) }
 0x326   : > { %642 = vperm.xlu0 (!%p786_p9), %911, %v639_v48  }
 0x3a5   : > { %v643_v51 = vpop.permute.xlu0 %642 }
 0x3a6   : > { %v645_v52 = vmul.f32 %v643_v51, %v638_v50 }
 0x3a8   : > { %646 = vst [vmem:[%s1180_s20] sm:$0xff] %v645_v52 }
 0x3a9 PF: > { %s655_s18 = smul.u32 %s998_s27, %s1002_s28  ;;  %s790_s21 = sshll.u32 %s1006_s29, 1 }
 0x3aa   : > { %s664_s22 = sshll.u32 %s1180_s20, 4  ;;  %s1292_s15 = sand.u32 1, %s990_s25   ;;  %s1212_s22 = int_to_ptr.vmem [resolvable:$true] %s664_s22 }
 0x3ab   : > { %s660_s8 = sadd.s32 %s790_s21, %s655_s18  ;;  %s648_s30 = scalar_lea.sflag [#allocation6], %s1292_s15 }
 0x3ac   : > { %s791_s23 = sshll.u32 %s660_s8, 7  ;;  %s912_s14 = scalar_lea.vmem %s1212_s22, 128 }
 0x3ad   : > { %s662_s13 = scalar_lea.hbm %s1276_s7, %s791_s23  ;;  %p913_p10 = scmp.ne.s32.totalorder %s1212_s22, %s912_s14 }
 0x3ae   : > { %s1030_s27 = smov [#allocation5]  }
 0x3af   : > { %p914_p11 = pnand %p913_p10, %p1135_p5  ;;  %s916_s28 = sshll.u32 %s1030_s27, 4  ;;  %s917_s28 = int_to_ptr.vmem [resolvable:$false] %s916_s28 }
 0x3b0   : > { %s918_s29 = scalar_lea.vmem %s917_s28, 256  ;;  %p919_p13 = scmp.lt.s32.totalorder %s1212_s22, %s917_s28 }
 0x3b1   : > { %p915_p12 = pneg %p914_p11  ;;  %p920_p0 = scmp.lt.s32.totalorder %s918_s29, %s912_s14 }
 0x3b3   : > { %p921_p1 = por %p920_p0, %p919_p13 }
 0x3b5   : > { %p922_p2 = pnand %p921_p1, %p915_p12 }
 0x3b7   : > { %925 = shalt.err (!%p922_p2)
}
 0x3b8   : > { %s926_s20 = scalar_lea.hbm %s662_s13, 128  ;;  %s930_s21 = scalar_lea.hbm %s1276_s7, 512 }
 0x3b9   : > { %p927_p3 = scmp.ne.s32.totalorder %s662_s13, %s926_s20  ;;  %p931_p8 = scmp.lt.u32.totalorder %s662_s13, %s1276_s7 }
 0x3ba   : > { %p932_p9 = scmp.lt.u32.totalorder %s930_s21, %s926_s20  ;;  %p934_p11 = scmp.lt.u32.totalorder %s926_s20, %s662_s13 }
 0x3bb   : > { %p928_p4 = pnand %p927_p3, %p1135_p5 }
 0x3bc   : > { %p933_p10 = por %p932_p9, %p931_p8 }
 0x3bd   : > { %p929_p6 = pneg %p928_p4 }
 0x3be   : > { %p935_p13 = por %p934_p11, %p933_p10 }
 0x3c0   : > { %p936_p12 = pnand %p935_p13, %p929_p6 }
 0x3c2   : > { %939 = shalt.err (!%p936_p12)
}
 0x3c3   : > { %808 = dma.vmem_to_hbm [thread:$0]  (%p1135_p5), %s1212_s22, 128, %s662_s13, %s648_s30  }
 0x3c4 PF: > { %p814_p0 = scmp.ge.s32.totalorder %s1022_s10, 2  ;;  %s676_s16 = sand.u32 1, %s986_s24  }
 0x3c5   : > { %s677_s9 = scalar_lea.sflag [#allocation6], %s676_s16 }
 0x3c6   : > { %p811_p1 = pnand %p814_p0, %p1144_p7 }
 0x3c8   : > { %981 = dma.done.wait (!%p811_p1), %s677_s9, 128  }
 0x3c9   : > { %983 = vsyncadd (!%p811_p1), %s677_s9, 4294967168  ;;  %s20_s10 = sadd.s32 1, %s1022_s10   ;;  %s1293_s27 = sld [smem:[#allocation8_spill]] }
 0x3ca   : > { %p17_p2 = scmp.ge.s32.totalorder %s20_s10, 10   ;;  %s1294_s28 = sld [smem:[#allocation9_spill]] }
 0x3cb   : > { %s1295_s29 = sld [smem:[#allocation10_spill]]  ;;  %s1296_s30 = sld [smem:[#allocation11_spill]] }
 0x3cc   : > { %s1297_s8 = sld [smem:[#allocation12_spill]]  ;;  %s1298_s9 = sld [smem:[#allocation13_spill]] }
 0x3cd   : > { %s1299_s24 = smov %s990_s25  ;;  %s1300_s25 = smov %s994_s26 }
 0x3ce   : > { %s1301_s26 = smov %s1156_s11  ;;  %19 = sbr.rel (!%p17_p2) target bundleno = 6 (0x6), region = 104 }
 0x3d5   :  { %682 = vsyncpa [#allocation6], 1 }
 0x3d6   :  { %684 = vsyncpa [#allocation6 + $0x1], 1 }

</bundles_post_ra>
